<compile_context>
chip_gen: v7x
topology: tpu7x:2x2x1
jax: 0.10.0
libtpu: 0.0.40
codegen_flags: <defaults>
</compile_context>

<pallas_src>
import jax
import jax.numpy as jnp
from jax.experimental import pallas as pl
from jax.experimental.pallas import tpu as pltpu


def _lambda_shortcut_kernel(x_ref, s_ref, o_ref):
    # x_ref: (NB, C, H*W)        lane-dense input block
    # s_ref: (H*W, H2*W2)        combined 0/1 selection matrix (grid-resident)
    # o_ref: (NB, C_out, H2*W2)  lane-dense output block, C_out = C + 2*pad
    NB, C, HW = x_ref.shape
    C_out, HW2 = o_ref.shape[1], o_ref.shape[2]
    pad = (C_out - C) // 2

    # One well-shaped MXU matmul does the stride-2 subsample of both spatial
    # dims at once (selection matrix is exact 0/1 -> bit-exact result).
    x = x_ref[...].reshape(NB * C, HW)
    ds = jnp.dot(x, s_ref[...], preferred_element_type=jnp.float32)
    ds = ds.reshape(NB, C, HW2).astype(o_ref.dtype)

    # Zero only the pad channel slices; write the payload exactly once.
    if pad > 0:
        zeros = jnp.zeros((NB, pad, HW2), dtype=o_ref.dtype)
        o_ref[:, :pad, :] = zeros
        o_ref[:, pad + C:, :] = zeros
    o_ref[:, pad:pad + C, :] = ds


def _pick_nb(N, C, per_image_bytes, target_bytes=2 << 20):
    """Images per grid step: ~2 MiB per-step tiles, divides N, >=2 grid steps."""
    if C % 8 != 0:
        # Keep the in-kernel (NB, C, HW) -> (NB*C, HW) reshape layout-trivial.
        return 1
    cap = max(1, target_bytes // per_image_bytes)
    if N >= 2:
        cap = min(cap, N // 2)  # keep at least 2 grid steps (v7x has 2 TCs)
    nb = 1
    for d in range(1, int(min(cap, N)) + 1):
        if N % d == 0:
            nb = d
    return nb


def lambda_layer(x, planes):
    """Pallas implementation of LambdaLayer with the option-A shortcut lambda."""
    N, C, H, W = x.shape
    assert H % 2 == 0 and W % 2 == 0
    H2, W2 = H // 2, W // 2
    pad = planes // 4
    C_out = C + 2 * pad
    HW, HW2 = H * W, H2 * W2

    itemsize = jnp.dtype(x.dtype).itemsize
    per_image_bytes = (C * HW + C_out * HW2) * itemsize
    NB = _pick_nb(N, C, per_image_bytes)

    # Lane-dense layouts: flatten spatial dims into the last axis.
    # Row-major contiguous reshapes -> metadata-only.
    x2 = x.reshape(N, C, HW)

    # Combined selection matrix: S[h*W + w, (h//2)*W2 + w//2] = 1 for even h, w.
    hw = jnp.arange(HW)
    h, w = hw // W, hw % W
    col = (h // 2) * W2 + (w // 2)
    valid = (h % 2 == 0) & (w % 2 == 0)
    S = jnp.where(valid[:, None] & (col[:, None] == jnp.arange(HW2)[None, :]),
                  1, 0).astype(x.dtype)

    out2 = pl.pallas_call(
        _lambda_shortcut_kernel,
        out_shape=jax.ShapeDtypeStruct((N, C_out, HW2), x.dtype),
        grid_spec=pltpu.PrefetchScalarGridSpec(
            num_scalar_prefetch=0,
            grid=(N // NB,),
            in_specs=[
                pl.BlockSpec((NB, C, HW), lambda n: (n, 0, 0)),
                pl.BlockSpec((HW, HW2), lambda n: (0, 0)),  # resident operand
            ],
            out_specs=pl.BlockSpec((NB, C_out, HW2), lambda n: (n, 0, 0)),
        ),
        compiler_params=pltpu.CompilerParams(
            dimension_semantics=("parallel",)),
    )(x2, S)

    # Contiguous split of the flattened spatial axis -> metadata-only reshape.
    return out2.reshape(N, C_out, H2, W2)


if __name__ == "__main__":
    key = jax.random.PRNGKey(0)
    N, C, H, W = 2, 4, 16, 16
    planes = 8  # -> channel pad of planes//4 = 2 on each side, C_out = 8

    x = jax.random.normal(key, (N, C, H, W), dtype=jnp.float32)

    out = lambda_layer(x, planes)
    out = jax.block_until_ready(out)

    # Pure-JAX reference of the PyTorch lambda:
    #   F.pad(x[:, :, ::2, ::2], (0,0,0,0, planes//4, planes//4), "constant", 0)
    pad = planes // 4
    ref = jnp.pad(x[:, :, ::2, ::2], ((0, 0), (pad, pad), (0, 0), (0, 0)))

    assert out.shape == (N, C + 2 * pad, H // 2, W // 2), out.shape
    assert jnp.allclose(out, ref, atol=1e-6), "mismatch vs reference"

    print("KERNEL_OK")
</pallas_src>

<mosaic_0001>
module attributes {stable_mosaic.version = 11 : i64} {
  func.func @_lambda_shortcut_kernel(%arg0: i32, %arg1: memref<1x4x256xf32, #tpu.memory_space<vmem>>, %arg2: memref<256x64xf32, #tpu.memory_space<vmem>>, %arg3: memref<1x8x64xf32, #tpu.memory_space<vmem>>) attributes {dimension_semantics = [#tpu.dimension_semantics<parallel>], iteration_bounds = array<i64: 2>, scalar_prefetch = 0 : i64, scratch_operands = 0 : i64, tpu.core_type = #tpu.core_type<tc>, window_params = [{transform_indices = @transform_0, window_bounds = array<i64: 1, 4, 256>}, {pipeline_mode = #tpu.pipeline_mode<synchronous>, transform_indices = @transform_1, window_bounds = array<i64: 256, 64>}, {transform_indices = @transform_2, window_bounds = array<i64: 1, 8, 64>}]} {
    %c0 = arith.constant 0 : index
    %c0_0 = arith.constant 0 : index
    %c0_1 = arith.constant 0 : index
    %0 = vector.load %arg1[%c0, %c0_0, %c0_1] : memref<1x4x256xf32, #tpu.memory_space<vmem>>, vector<1x4x256xf32>
    %1 = vector.shape_cast %0 : vector<1x4x256xf32> to vector<4x256xf32>
    %c0_2 = arith.constant 0 : index
    %c0_3 = arith.constant 0 : index
    %2 = vector.load %arg2[%c0_2, %c0_3] : memref<256x64xf32, #tpu.memory_space<vmem>>, vector<256x64xf32>
    %cst = arith.constant dense<0.000000e+00> : vector<4x64xf32>
    %3 = tpu.matmul %1, %2, %cst {dimension_numbers = #tpu.dot_dimension_numbers<[1], [0], [0], [1], [0, 0, 1, 1], [], []>} : vector<4x256xf32>, vector<256x64xf32>, vector<4x64xf32> -> vector<4x64xf32>
    %4 = vector.shape_cast %3 : vector<4x64xf32> to vector<1x4x64xf32>
    %cst_4 = arith.constant 0.000000e+00 : f32
    %5 = vector.broadcast %cst_4 : f32 to vector<1x2x64xf32>
    %c0_5 = arith.constant 0 : index
    %c0_6 = arith.constant 0 : index
    %c0_7 = arith.constant 0 : index
    %6 = vector.load %arg3[%c0_5, %c0_6, %c0_7] : memref<1x8x64xf32, #tpu.memory_space<vmem>>, vector<1x2x64xf32>
    tpu.vector_store %arg3[%c0_5, %c0_6, %c0_7], %5 {strides = array<i32>} : memref<1x8x64xf32, #tpu.memory_space<vmem>>, vector<1x2x64xf32>,
    %c0_8 = arith.constant 0 : index
    %c6 = arith.constant 6 : index
    %c0_9 = arith.constant 0 : index
    %7 = vector.load %arg3[%c0_8, %c6, %c0_9] : memref<1x8x64xf32, #tpu.memory_space<vmem>>, vector<1x2x64xf32>
    tpu.vector_store %arg3[%c0_8, %c6, %c0_9], %5 {strides = array<i32>} : memref<1x8x64xf32, #tpu.memory_space<vmem>>, vector<1x2x64xf32>,
    %c0_10 = arith.constant 0 : index
    %c2 = arith.constant 2 : index
    %c0_11 = arith.constant 0 : index
    %8 = vector.load %arg3[%c0_10, %c2, %c0_11] : memref<1x8x64xf32, #tpu.memory_space<vmem>>, vector<1x4x64xf32>
    tpu.vector_store %arg3[%c0_10, %c2, %c0_11], %4 {strides = array<i32>} : memref<1x8x64xf32, #tpu.memory_space<vmem>>, vector<1x4x64xf32>,
    return
  }
  func.func @transform_0(%arg0: i32) -> (i32, i32, i32) {
    %c0_i32 = arith.constant 0 : i32
    %c0_i32_0 = arith.constant 0 : i32
    %c0_i32_1 = arith.constant 0 : i32
    return %arg0, %c0_i32, %c0_i32_0 : i32, i32, i32
  }
  func.func @transform_1(%arg0: i32) -> (i32, i32) {
    %c0_i32 = arith.constant 0 : i32
    %c0_i32_0 = arith.constant 0 : i32
    %c0_i32_1 = arith.constant 0 : i32
    return %c0_i32, %c0_i32_0 : i32, i32
  }
  func.func @transform_2(%arg0: i32) -> (i32, i32, i32) {
    %c0_i32 = arith.constant 0 : i32
    %c0_i32_0 = arith.constant 0 : i32
    %c0_i32_1 = arith.constant 0 : i32
    return %arg0, %c0_i32, %c0_i32_0 : i32, i32, i32
  }
}

</mosaic_0001>

<bundles_post_ra>
// kernel: tpu_custom_call.1
= control target key start
LH: loop header
LB: loop body
LE: loop exit
PB: predicated region body
PF: predicated region fallthrough
CT: control target
= control target key end

     0   :  { %7 = vsyncpa [#allocation3], 0  ;;  %s723_s0 = inlined_call_operand.vmem [shape: f32[2,4,256], index: 0, kind: input, shape index: {}]   ;;  %s724_s1 = inlined_call_operand.vmem [shape: f32[256,64], index: 1, kind: input, shape index: {}]   ;;  %s725_s2 = inlined_call_operand.hbm [shape: f32[2,8,64], index: 2, kind: output, shape index: {}]  }
   0x1   :  { %9 = vsyncpa [#allocation3 + $0x1], 0  ;;  %s527_s9 = smov 0   ;;  %s529_s10 = smov 0  }
   0x2   :  { %s531_s11 = smov 0   ;;  %s533_s12 = smov 0  }
   0x3 LB: > { %s548_s13 = sadd.s32 4294967295, %s508_s12   ;;  %s326_s14 = sadd.s32 4294967294, %s508_s12   ;;  %s508_s12 = sphi %s533_s12, %s731_s12   ;;  %s504_s11 = sphi %s531_s11, %s730_s11   ;;  %s500_s10 = sphi %s529_s10, %s729_s10   ;;  %s496_s9 = sphi %s527_s9, %s728_s9  }
   0x4   : > { %s552_s15 = sadd.s32 1, %s508_s12   ;;  %s69_s16 = sadd.s32 1, %s504_s11 }
   0x5   : > { %s66_s17 = ssub.s32 %s508_s12, %s552_s15  ;;  %p79_p0 = scmp.ne.s32.totalorder %s504_s11, %s500_s10 }
   0x6   : > { %p67_p1 = scmp.eq.s32.totalorder %s66_s17, 0  ;;  %p80_p2 = scmp.eq.s32.totalorder %s548_s13, 1 }
   0x7   : > { %p85_p3 = scmp.ne.s32.totalorder %s500_s10, %s496_s9  ;;  %p86_p4 = scmp.eq.s32.totalorder %s326_s14, 1 }
   0x8   : > { %s563_s18 = scalar_select %p67_p1, %s504_s11, %s69_s16  }
   0x9   : > { %p565_p5 = por %p80_p2, %p79_p0  ;;  %p569_p6 = por %p86_p4, %p85_p3 }
   0xa   : > { %p329_p7 = scmp.ge.s32.totalorder %s508_s12, 1  ;;  %p115_p8 = scmp.lt.s32.totalorder %s508_s12, 3 }
   0xc   : > { %p116_p9 = pnand %p329_p7, %p115_p8 }
   0xd   : > { %v159_v0 = vld [vmem:[%s724_s1 + $0x80] sm:$0xff] (!%p116_p9)  ;;  %v160_v1 = vld [vmem:[%s724_s1 + $0x88] sm:$0xff] (!%p116_p9)  ;;  %p137_p10 = scmp.lt.s32.totalorder (!%p116_p9), %s548_s13, 1  ;;  %v161_v5 = vld [vmem:[%s724_s1 + $0x90] sm:$0xff] (!%p116_p9)  ;;  %s134_s5 = sand.u32 (!%p116_p9), 1, %s500_s10   ;;  %vm248_vm0 = vcmask (!%p116_p9), 517120  }
   0xe   : > { %119 = sbr.rel (%p116_p9) target bundleno = 277 (0x115), region = 28  ;;  %v143_v2 = vld [vmem:[%s724_s1] sm:$0xff] (!%p116_p9)  ;;  %v373_v3 = vpack.c.bf16 (!%p116_p9), %v160_v1, %v159_v0  ;;  %v144_v4 = vld [vmem:[%s724_s1 + $0x8] sm:$0xff] (!%p116_p9)  ;;  %v162_v6 = vld [vmem:[%s724_s1 + $0x98] sm:$0xff] (!%p116_p9)  ;;  %v510_v50 = vmov (!%p116_p9), 0.0   ;;  %s334_s8 = sshll.u32 (!%p116_p9), %s548_s13, 7 }
   0xf   : > { %v375_v7 = vpack.c.bf16 (!%p116_p9), %v144_v4, %v143_v2  ;;  %v377_v8 = vpack.c.bf16 (!%p116_p9), %v162_v6, %v161_v5  ;;  %v145_v9 = vld [vmem:[%s724_s1 + $0x10] sm:$0xff] (!%p116_p9)  ;;  %v146_v10 = vld [vmem:[%s724_s1 + $0x18] sm:$0xff] (!%p116_p9)  ;;  %v163_v11 = vld [vmem:[%s724_s1 + $0xa0] sm:$0xff] (!%p116_p9)  ;;  %vm251_vm1 = vcmask (!%p116_p9), 519168   ;;  %s681_s21 = scalar_lea.hbm (!%p116_p9), %s725_s2, %s334_s8  ;;  %s254_s22 = scalar_lea.sflag (!%p116_p9), [#allocation3], %s134_s5 }
  0x10   : > { %374 = vmatprep.subr.bf16.mxu0 (!%p116_p9), %v373_v3  ;;  %v164_v12 = vld [vmem:[%s724_s1 + $0xa8] sm:$0xff] (!%p116_p9)  ;;  %v379_v13 = vpack.c.bf16 (!%p116_p9), %v146_v10, %v145_v9  ;;  %v147_v15 = vld [vmem:[%s724_s1 + $0x20] sm:$0xff] (!%p116_p9)  ;;  %v165_v17 = vld [vmem:[%s724_s1 + $0xb0] sm:$0xff] (!%p116_p9) }
  0x11   : > { %376 = vmatpush3.bf16.msra.mxu0 (!%p116_p9), %v375_v7  ;;  %v381_v14 = vpack.c.bf16 (!%p116_p9), %v164_v12, %v163_v11  ;;  %v148_v16 = vld [vmem:[%s724_s1 + $0x28] sm:$0xff] (!%p116_p9)  ;;  %v166_v18 = vld [vmem:[%s724_s1 + $0xb8] sm:$0xff] (!%p116_p9)  ;;  %v149_v21 = vld [vmem:[%s724_s1 + $0x30] sm:$0xff] (!%p116_p9) }
  0x12   : > { %378 = vmatprep.subr.bf16.mxu0 (!%p116_p9), %v377_v8  ;;  %v383_v19 = vpack.c.bf16 (!%p116_p9), %v148_v16, %v147_v15  ;;  %v385_v20 = vpack.c.bf16 (!%p116_p9), %v166_v18, %v165_v17  ;;  %v150_v22 = vld [vmem:[%s724_s1 + $0x38] sm:$0xff] (!%p116_p9)  ;;  %v167_v23 = vld [vmem:[%s724_s1 + $0xc0] sm:$0xff] (!%p116_p9)  ;;  %v168_v24 = vld [vmem:[%s724_s1 + $0xc8] sm:$0xff] (!%p116_p9) }
  0x13   : > { %v387_v27 = vpack.c.bf16 (!%p116_p9), %v150_v22, %v149_v21  ;;  %v389_v28 = vpack.c.bf16 (!%p116_p9), %v168_v24, %v167_v23  ;;  %v151_v29 = vld [vmem:[%s724_s1 + $0x40] sm:$0xff] (!%p116_p9)  ;;  %v152_v30 = vld [vmem:[%s724_s1 + $0x48] sm:$0xff] (!%p116_p9)  ;;  %v169_v31 = vld [vmem:[%s724_s1 + $0xd0] sm:$0xff] (!%p116_p9) }
  0x14   : > { %v170_v32 = vld [vmem:[%s724_s1 + $0xd8] sm:$0xff] (!%p116_p9)  ;;  %v391_v33 = vpack.c.bf16 (!%p116_p9), %v152_v30, %v151_v29  ;;  %v153_v35 = vld [vmem:[%s724_s1 + $0x50] sm:$0xff] (!%p116_p9)  ;;  %v171_v37 = vld [vmem:[%s724_s1 + $0xe0] sm:$0xff] (!%p116_p9) }
  0x15   : > { %s138_s17 = scalar_select %p137_p10, %s548_s13, 1  ;;  %380 = vmatpush3.bf16.msra.mxu0 %v379_v13  ;;  %v393_v34 = vpack.c.bf16 %v170_v32, %v169_v31  ;;  %v154_v36 = vld [vmem:[%s724_s1 + $0x58] sm:$0xff]  ;;  %v172_v38 = vld [vmem:[%s724_s1 + $0xe8] sm:$0xff]  ;;  %v155_v41 = vld [vmem:[%s724_s1 + $0x60] sm:$0xff] }
  0x16   : > { %382 = vmatprep.subr.bf16.mxu0 %v381_v14  ;;  %v395_v39 = vpack.c.bf16 %v154_v36, %v153_v35  ;;  %v397_v40 = vpack.c.bf16 %v172_v38, %v171_v37  ;;  %v156_v42 = vld [vmem:[%s724_s1 + $0x68] sm:$0xff]  ;;  %v173_v43 = vld [vmem:[%s724_s1 + $0xf0] sm:$0xff]  ;;  %v174_v44 = vld [vmem:[%s724_s1 + $0xf8] sm:$0xff]  ;;  %s511_s13 = smov [#allocation2]  }
  0x17   : > { %s337_s23 = sshll.u32 %s138_s17, 3  ;;  %v399_v45 = vpack.c.bf16 %v156_v42, %v155_v41  ;;  %v401_v46 = vpack.c.bf16 %v174_v44, %v173_v43  ;;  %v157_v47 = vld [vmem:[%s724_s1 + $0x70] sm:$0xff]  ;;  %v158_v48 = vld [vmem:[%s724_s1 + $0x78] sm:$0xff] }
  0x18   : > { %s141_s6 = scalar_lea.vmem %s723_s0, %s337_s23  ;;  %v403_v49 = vpack.c.bf16 %v158_v48, %v157_v47  ;;  %s450_s23 = sshll.u32 %s511_s13, 4  ;;  %s451_s23 = int_to_ptr.vmem [resolvable:$false] %s450_s23 }
  0x19   : > { %v142_v25 = vld [vmem:[%s141_s6] sm:$0xff]  ;;  %384 = vmatpush3.bf16.msra.mxu0 %v383_v19  ;;  %s330_s6 = sshll.u32 %s134_s5, 3  ;;  %s452_s25 = scalar_lea.vmem %s451_s23, 256 }
  0x1a   : > { %v176_v26 = vcombine.high %v142_v25, %v142_v25  ;;  %386 = vmatprep.subr.bf16.mxu0 %v385_v20  ;;  %s136_s7 = scalar_lea.vmem [#allocation2], %s330_s6 }
  0x1b   : > { %249 = vst.msk [vmem:[%s136_s7] sm:$0x3] %vm248_vm0, %v510_v50  ;;  %250 = vst.msk [vmem:[%s136_s7 + $0x6] sm:$0x3] %vm248_vm0, %v510_v50  ;;  %s267_s14 = sshll.u32 %s136_s7, 4  ;;  %s683_s14 = int_to_ptr.vmem [resolvable:$true] %s267_s14 }
  0x1c   : > { %242 = vmatprep.mubr.f32.mxu0 %v176_v26  ;;  %s446_s24 = scalar_lea.vmem %s683_s14, 128  ;;  %p453_p0 = scmp.lt.s32.totalorder %s683_s14, %s451_s23 }
  0x1d   : > { %388 = vmatpush3.bf16.msra.mxu0 %v387_v27  ;;  %p447_p11 = scmp.ne.s32.totalorder %s683_s14, %s446_s24  ;;  %p454_p1 = scmp.lt.s32.totalorder %s452_s25, %s446_s24 }
  0x1e   : > { %390 = vmatprep.subr.bf16.mxu0 %v389_v28 }
  0x1f   : > { %p448_p12 = pnand %p447_p11, %p565_p5  ;;  %p455_p2 = por %p454_p1, %p453_p0 }
  0x21   : > { %392 = vmatpush3.bf16.msra.mxu0 %v391_v33  ;;  %p449_p13 = pneg %p448_p12 }
  0x22   : > { %394 = vmatprep.subr.bf16.mxu0 %v393_v34 }
  0x23   : > { %p456_p3 = pnand %p455_p2, %p449_p13 }
  0x25   : > { %396 = vmatpush3.bf16.msra.mxu0 %v395_v39 }
  0x26   : > { %398 = vmatprep.subr.bf16.mxu0 %v397_v40 }
  0x29   : > { %400 = vmatpush3.bf16.msra.mxu0 %v399_v45 }
  0x2a   : > { %402 = vmatprep.subr.bf16.mxu0 %v401_v46 }
  0x2d   : > { %404 = vmatpush3.bf16.msra.mxu0 %v403_v49 }
  0x30   : > { %243 = vmatmul.mubr.f32.vlgmr.msra.gmra.mrb[0].mxu0 %v142_v25 }
 0x103   : > { %v370_v51 = vpop.f32.mrb[0].mxu0 }
 0x104   : > { %v371_v52 = vpop.f32.mrb[1].mxu0 }
 0x105   : > { %v372_v53 = vadd.f32 %v371_v52, %v370_v51 }
 0x107   : > { %252 = vst.msk [vmem:[%s136_s7 + $0x2] sm:$0xf] %vm251_vm1, %v372_v53 }
 0x108   : > { %459 = shalt.err (!%p456_p3)
}
 0x109   : > { %s460_s26 = scalar_lea.hbm %s681_s21, 128  ;;  %s464_s29 = scalar_lea.hbm %s725_s2, 256 }
 0x10a   : > { %p461_p4 = scmp.ne.s32.totalorder %s681_s21, %s460_s26  ;;  %p465_p9 = scmp.lt.u32.totalorder %s681_s21, %s725_s2 }
 0x10b   : > { %p466_p10 = scmp.lt.u32.totalorder %s464_s29, %s460_s26  ;;  %p468_p12 = scmp.lt.u32.totalorder %s460_s26, %s681_s21 }
 0x10c   : > { %p462_p7 = pnand %p461_p4, %p565_p5 }
 0x10d   : > { %p467_p11 = por %p466_p10, %p465_p9 }
 0x10e   : > { %p463_p8 = pneg %p462_p7 }
 0x10f   : > { %p469_p13 = por %p468_p12, %p467_p11 }
 0x111   : > { %p470_p0 = pnand %p469_p13, %p463_p8 }
 0x113   : > { %473 = shalt.err (!%p470_p0)
}
 0x114   : > { %405 = dma.vmem_to_hbm [thread:$0]  (%p565_p5), %s683_s14, 128, %s681_s21, %s254_s22  }
 0x115 PF: > { %p411_p1 = scmp.ge.s32.totalorder %s508_s12, 2  ;;  %s279_s4 = sand.u32 1, %s496_s9  }
 0x116   : > { %s280_s5 = scalar_lea.sflag [#allocation3], %s279_s4 }
 0x117   : > { %p408_p2 = pnand %p411_p1, %p569_p6 }
 0x119   : > { %491 = dma.done.wait (!%p408_p2), %s280_s5, 128  }
 0x11a   : > { %493 = vsyncadd (!%p408_p2), %s280_s5, 4294967168  ;;  %p12_p3 = scmp.ge.s32.totalorder %s552_s15, 4   ;;  %s728_s9 = smov %s500_s10 }
 0x11b   : > { %s729_s10 = smov %s504_s11  ;;  %s730_s11 = smov %s563_s18 }
 0x11c   : > { %s731_s12 = smov %s552_s15  ;;  %14 = sbr.rel (!%p12_p3) target bundleno = 3 (0x3), region = 63 }
 0x123   :  { %285 = vsyncpa [#allocation3], 1 }
 0x124   :  { %287 = vsyncpa [#allocation3 + $0x1], 1 }

</bundles_post_ra>
